<compile_context>
chip_gen: v7x
topology: tpu7x:2x2x1
jax: 0.10.0
libtpu: 0.0.40
codegen_flags: <defaults>
</compile_context>

<pallas_src>
from functools import partial

import jax
import jax.numpy as jnp
from jax.experimental import pallas as pl
from jax.experimental.pallas import tpu as pltpu


def mlp_kernel(x_ref, w_ref, b_ref, out_ref):
    """One batch tile of the full MLP forward pass.

    x_ref   : [num_inputs, Bt]   bf16 activations, batch on the lane axis
    w_ref   : [L, Hp, Hp]        bf16 packed weights, W_l stored [out, in] (zero-padded)
    b_ref   : [L, Hp, 1]         f32 packed biases (zero-padded)
    out_ref : [num_outputs, Bt]  f32 lane-dense output tile
    """
    num_inputs = x_ref.shape[0]
    n_linear = w_ref.shape[0]           # num_layers + 1 linear layers
    num_outputs = out_ref.shape[0]
    Hp = w_ref.shape[1]
    # sublane-aligned row count actually needed by the output layer
    out_rows = min(Hp, ((num_outputs + 7) // 8) * 8)
    mm_dtype = w_ref.dtype              # bf16 MXU operand dtype (all TPU gens)

    # Layer 0: Linear(num_inputs -> H) + Tanh. Static column slice of the packed
    # slab so the streamed x tile stays num_inputs rows wide.
    x = x_ref[...]                                        # bf16 [num_inputs, Bt]
    w0 = w_ref[0][:, :num_inputs]                         # bf16 [Hp, num_inputs]
    z = jnp.dot(w0, x, preferred_element_type=jnp.float32) + b_ref[0]
    h = jnp.tanh(z)                                       # f32 tanh (EUP slack)

    # Hidden layers 1 .. n_linear-2: Linear(H -> H) + Tanh.
    for l in range(1, n_linear - 1):
        z = jnp.dot(w_ref[l], h.astype(mm_dtype),
                    preferred_element_type=jnp.float32) + b_ref[l]
        h = jnp.tanh(z)                                   # f32 tanh

    # Output layer: Linear(H -> num_outputs), no activation. Only compute the
    # sublane-aligned out_rows slab of the padded weight, then slice real rows.
    w_last = w_ref[n_linear - 1][:out_rows, :]            # bf16 [out_rows, Hp]
    b_last = b_ref[n_linear - 1][:out_rows, :]            # f32  [out_rows, 1]
    z = jnp.dot(w_last, h.astype(mm_dtype),
                preferred_element_type=jnp.float32) + b_last
    out_ref[...] = z[:num_outputs, :].astype(out_ref.dtype)


def pack_params(params):
    """Pack torch-layout params (W [out,in], b [out]) into two padded slabs.

    Call this ONCE per parameter set and reuse the slabs across forward calls.
    Returns (w_slab bf16 [L, Hp, Hp], b_slab f32 [L, Hp, 1], num_outputs).
    Zero padding is mathematically inert: padded rows give tanh(0)=0 and padded
    columns multiply by 0.
    """
    n_linear = len(params)
    Hp = max(max(W.shape[0], W.shape[1]) for W, _ in params)
    Hp = ((Hp + 7) // 8) * 8
    w_slab = jnp.zeros((n_linear, Hp, Hp), jnp.float32)
    b_slab = jnp.zeros((n_linear, Hp, 1), jnp.float32)
    for l, (W, b) in enumerate(params):
        w_slab = w_slab.at[l, :W.shape[0], :W.shape[1]].set(W.astype(jnp.float32))
        b_slab = b_slab.at[l, :b.shape[0], 0].set(b.astype(jnp.float32))
    # bf16 weights feed the MXU natively on every TPU generation (f32 accumulate
    # via preferred_element_type); biases stay f32 (added on the VPU into the
    # f32 accumulator).
    return w_slab.astype(jnp.bfloat16), b_slab, params[-1][0].shape[0]


@partial(jax.jit, static_argnames=("num_outputs", "tile_b"))
def mlp_forward(x, w_slab, b_slab, *, num_outputs, tile_b=8192):
    """Forward pass. x: [B, num_inputs] f32 (torch layout) -> [B, num_outputs] f32."""
    B, num_inputs = x.shape
    n_linear, Hp, _ = w_slab.shape

    LANE = 128
    # Batch tile: multiple of 128 lanes, large default to amortize grid-step
    # overhead, capped so very large tiles stay within v7x's scoped VMEM.
    tile_b = min(int(tile_b), 32768)
    tile_b = max(LANE, (tile_b // LANE) * LANE)
    Bp = ((B + LANE - 1) // LANE) * LANE
    if Bp <= tile_b:
        if Bp >= 2 * LANE:
            # Split into (at least) 2 grid steps so both v7x TensorCores get work.
            tile_b = ((Bp // 2 + LANE - 1) // LANE) * LANE
        else:
            tile_b = Bp
    Bp = ((B + tile_b - 1) // tile_b) * tile_b

    # Batch on the lane axis; padded lanes are explicit zeros (inert, sliced off).
    xT = jnp.zeros((num_inputs, Bp), jnp.bfloat16)
    xT = xT.at[:, :B].set(x.T.astype(jnp.bfloat16))

    grid = (Bp // tile_b,)

    outT = pl.pallas_call(
        mlp_kernel,
        out_shape=jax.ShapeDtypeStruct((num_outputs, Bp), jnp.float32),
        grid=grid,
        in_specs=[
            # streamed activations: one lane-tile of the batch per grid step
            pl.BlockSpec((num_inputs, tile_b), lambda i: (0, i)),
            # parameter slabs: constant block index -> fetched once, VMEM-resident
            pl.BlockSpec((n_linear, Hp, Hp), lambda i: (0, 0, 0)),
            pl.BlockSpec((n_linear, Hp, 1), lambda i: (0, 0, 0)),
        ],
        out_specs=pl.BlockSpec((num_outputs, tile_b), lambda i: (0, i)),
        compiler_params=pltpu.CompilerParams(
            # shards the batch grid across v7x's 2 TensorCores; harmless on 1-TC chips
            dimension_semantics=("parallel",),
        ),
    )(xT, w_slab, b_slab)

    return outT[:, :B].T


def init_params(key, num_inputs, num_neurals=32, num_layers=4, num_outputs=1):
    """Deterministic init matching torch.nn.Linear defaults (torch layout W[out,in])."""
    dims = [num_inputs] + [num_neurals] * num_layers + [num_outputs]
    params = []
    for i in range(len(dims) - 1):
        fan_in, fan_out = dims[i], dims[i + 1]
        key, kw, kb = jax.random.split(key, 3)
        bound = 1.0 / (fan_in ** 0.5)
        w = jax.random.uniform(kw, (fan_out, fan_in), jnp.float32, -bound, bound)
        b = jax.random.uniform(kb, (fan_out,), jnp.float32, -bound, bound)
        params.append((w, b))
    return params


def reference_forward(x, params):
    """Pure-JAX f32 reference (torch semantics: y = x @ W^T + b)."""
    h = x
    for w, b in params[:-1]:
        h = jnp.tanh(h @ w.T + b)
    return h @ params[-1][0].T + params[-1][1]


if __name__ == "__main__":
    key = jax.random.PRNGKey(0)
    k_x, k_x2, k_p = jax.random.split(key, 3)

    num_inputs = 4
    num_neurals = 32
    num_layers = 4
    num_outputs = 1

    params = init_params(k_p, num_inputs, num_neurals, num_layers, num_outputs)
    w_slab, b_slab, n_out = pack_params(params)   # packed once, reused

    # bf16 MXU operands give ~1e-2-level absolute error vs. the f32 reference
    # (tanh itself is in f32 now); tolerance sized accordingly.
    tol = 5e-2

    # Small batch (single grid step).
    x = jax.random.normal(k_x, (8, num_inputs), jnp.float32)
    out = jax.block_until_ready(mlp_forward(x, w_slab, b_slab, num_outputs=n_out))
    ref = reference_forward(x, params)
    assert out.shape == (8, num_outputs)
    assert jnp.allclose(out, ref, atol=tol, rtol=tol), "mismatch vs reference (B=8)"

    # Larger batch that exercises the multi-step 'parallel' grid and lane padding.
    x2 = jax.random.normal(k_x2, (384, num_inputs), jnp.float32)
    out2 = jax.block_until_ready(mlp_forward(x2, w_slab, b_slab, num_outputs=n_out))
    ref2 = reference_forward(x2, params)
    assert out2.shape == (384, num_outputs)
    assert jnp.allclose(out2, ref2, atol=tol, rtol=tol), "mismatch vs reference (B=384)"

    print("KERNEL_OK")
</pallas_src>

<mosaic_0001>
module attributes {stable_mosaic.version = 11 : i64} {
  func.func @mlp_kernel(%arg0: i32, %arg1: memref<4x128xbf16, #tpu.memory_space<vmem>>, %arg2: memref<5x32x32xbf16, #tpu.memory_space<vmem>>, %arg3: memref<5x32x1xf32, #tpu.memory_space<vmem>>, %arg4: memref<1x128xf32, #tpu.memory_space<vmem>>) attributes {dimension_semantics = [#tpu.dimension_semantics<parallel>], iteration_bounds = array<i64: 1>, scalar_prefetch = 0 : i64, scratch_operands = 0 : i64, tpu.core_type = #tpu.core_type<tc>, window_params = [{transform_indices = @transform_0, window_bounds = array<i64: 4, 128>}, {pipeline_mode = #tpu.pipeline_mode<synchronous>, transform_indices = @transform_1, window_bounds = array<i64: 5, 32, 32>}, {pipeline_mode = #tpu.pipeline_mode<synchronous>, transform_indices = @transform_2, window_bounds = array<i64: 5, 32, 1>}, {transform_indices = @transform_3, window_bounds = array<i64: 1, 128>}]} {
    %c0 = arith.constant 0 : index
    %c0_0 = arith.constant 0 : index
    %0 = vector.load %arg1[%c0, %c0_0] : memref<4x128xbf16, #tpu.memory_space<vmem>>, vector<4x128xbf16>
    %c0_1 = arith.constant 0 : index
    %c0_2 = arith.constant 0 : index
    %c0_3 = arith.constant 0 : index
    %1 = vector.load %arg2[%c0_1, %c0_2, %c0_3] : memref<5x32x32xbf16, #tpu.memory_space<vmem>>, vector<1x32x32xbf16>
    %2 = vector.shape_cast %1 : vector<1x32x32xbf16> to vector<32x32xbf16>
    %3 = vector.extract_strided_slice %2 {offsets = [0, 0], sizes = [32, 4], strides = [1, 1]} : vector<32x32xbf16> to vector<32x4xbf16>
    %cst = arith.constant dense<0.000000e+00> : vector<32x128xf32>
    %4 = tpu.matmul %3, %0, %cst {dimension_numbers = #tpu.dot_dimension_numbers<[1], [0], [0], [1], [0, 0, 1, 1], [], []>} : vector<32x4xbf16>, vector<4x128xbf16>, vector<32x128xf32> -> vector<32x128xf32>
    %c0_4 = arith.constant 0 : index
    %c0_5 = arith.constant 0 : index
    %c0_6 = arith.constant 0 : index
    %5 = vector.load %arg3[%c0_4, %c0_5, %c0_6] : memref<5x32x1xf32, #tpu.memory_space<vmem>>, vector<1x32x1xf32>
    %6 = vector.shape_cast %5 : vector<1x32x1xf32> to vector<32x1xf32>
    %7 = vector.broadcast %6 : vector<32x1xf32> to vector<32x128xf32>
    %8 = arith.addf %4, %7 : vector<32x128xf32>
    %9 = math.tanh %8 : vector<32x128xf32>
    %c1 = arith.constant 1 : index
    %c0_7 = arith.constant 0 : index
    %c0_8 = arith.constant 0 : index
    %10 = vector.load %arg2[%c1, %c0_7, %c0_8] : memref<5x32x32xbf16, #tpu.memory_space<vmem>>, vector<1x32x32xbf16>
    %11 = vector.shape_cast %10 : vector<1x32x32xbf16> to vector<32x32xbf16>
    %12 = arith.truncf %9 : vector<32x128xf32> to vector<32x128xbf16>
    %cst_9 = arith.constant dense<0.000000e+00> : vector<32x128xf32>
    %13 = tpu.matmul %11, %12, %cst_9 {dimension_numbers = #tpu.dot_dimension_numbers<[1], [0], [0], [1], [0, 0, 1, 1], [], []>} : vector<32x32xbf16>, vector<32x128xbf16>, vector<32x128xf32> -> vector<32x128xf32>
    %c1_10 = arith.constant 1 : index
    %c0_11 = arith.constant 0 : index
    %c0_12 = arith.constant 0 : index
    %14 = vector.load %arg3[%c1_10, %c0_11, %c0_12] : memref<5x32x1xf32, #tpu.memory_space<vmem>>, vector<1x32x1xf32>
    %15 = vector.shape_cast %14 : vector<1x32x1xf32> to vector<32x1xf32>
    %16 = vector.broadcast %15 : vector<32x1xf32> to vector<32x128xf32>
    %17 = arith.addf %13, %16 : vector<32x128xf32>
    %18 = math.tanh %17 : vector<32x128xf32>
    %c2 = arith.constant 2 : index
    %c0_13 = arith.constant 0 : index
    %c0_14 = arith.constant 0 : index
    %19 = vector.load %arg2[%c2, %c0_13, %c0_14] : memref<5x32x32xbf16, #tpu.memory_space<vmem>>, vector<1x32x32xbf16>
    %20 = vector.shape_cast %19 : vector<1x32x32xbf16> to vector<32x32xbf16>
    %21 = arith.truncf %18 : vector<32x128xf32> to vector<32x128xbf16>
    %cst_15 = arith.constant dense<0.000000e+00> : vector<32x128xf32>
    %22 = tpu.matmul %20, %21, %cst_15 {dimension_numbers = #tpu.dot_dimension_numbers<[1], [0], [0], [1], [0, 0, 1, 1], [], []>} : vector<32x32xbf16>, vector<32x128xbf16>, vector<32x128xf32> -> vector<32x128xf32>
    %c2_16 = arith.constant 2 : index
    %c0_17 = arith.constant 0 : index
    %c0_18 = arith.constant 0 : index
    %23 = vector.load %arg3[%c2_16, %c0_17, %c0_18] : memref<5x32x1xf32, #tpu.memory_space<vmem>>, vector<1x32x1xf32>
    %24 = vector.shape_cast %23 : vector<1x32x1xf32> to vector<32x1xf32>
    %25 = vector.broadcast %24 : vector<32x1xf32> to vector<32x128xf32>
    %26 = arith.addf %22, %25 : vector<32x128xf32>
    %27 = math.tanh %26 : vector<32x128xf32>
    %c3 = arith.constant 3 : index
    %c0_19 = arith.constant 0 : index
    %c0_20 = arith.constant 0 : index
    %28 = vector.load %arg2[%c3, %c0_19, %c0_20] : memref<5x32x32xbf16, #tpu.memory_space<vmem>>, vector<1x32x32xbf16>
    %29 = vector.shape_cast %28 : vector<1x32x32xbf16> to vector<32x32xbf16>
    %30 = arith.truncf %27 : vector<32x128xf32> to vector<32x128xbf16>
    %cst_21 = arith.constant dense<0.000000e+00> : vector<32x128xf32>
    %31 = tpu.matmul %29, %30, %cst_21 {dimension_numbers = #tpu.dot_dimension_numbers<[1], [0], [0], [1], [0, 0, 1, 1], [], []>} : vector<32x32xbf16>, vector<32x128xbf16>, vector<32x128xf32> -> vector<32x128xf32>
    %c3_22 = arith.constant 3 : index
    %c0_23 = arith.constant 0 : index
    %c0_24 = arith.constant 0 : index
    %32 = vector.load %arg3[%c3_22, %c0_23, %c0_24] : memref<5x32x1xf32, #tpu.memory_space<vmem>>, vector<1x32x1xf32>
    %33 = vector.shape_cast %32 : vector<1x32x1xf32> to vector<32x1xf32>
    %34 = vector.broadcast %33 : vector<32x1xf32> to vector<32x128xf32>
    %35 = arith.addf %31, %34 : vector<32x128xf32>
    %36 = math.tanh %35 : vector<32x128xf32>
    %c4 = arith.constant 4 : index
    %c0_25 = arith.constant 0 : index
    %c0_26 = arith.constant 0 : index
    %37 = vector.load %arg2[%c4, %c0_25, %c0_26] : memref<5x32x32xbf16, #tpu.memory_space<vmem>>, vector<1x32x32xbf16>
    %38 = vector.shape_cast %37 : vector<1x32x32xbf16> to vector<32x32xbf16>
    %39 = vector.extract_strided_slice %38 {offsets = [0, 0], sizes = [8, 32], strides = [1, 1]} : vector<32x32xbf16> to vector<8x32xbf16>
    %c4_27 = arith.constant 4 : index
    %c0_28 = arith.constant 0 : index
    %c0_29 = arith.constant 0 : index
    %40 = vector.load %arg3[%c4_27, %c0_28, %c0_29] : memref<5x32x1xf32, #tpu.memory_space<vmem>>, vector<1x32x1xf32>
    %41 = vector.shape_cast %40 : vector<1x32x1xf32> to vector<32x1xf32>
    %42 = vector.extract_strided_slice %41 {offsets = [0, 0], sizes = [8, 1], strides = [1, 1]} : vector<32x1xf32> to vector<8x1xf32>
    %43 = arith.truncf %36 : vector<32x128xf32> to vector<32x128xbf16>
    %cst_30 = arith.constant dense<0.000000e+00> : vector<8x128xf32>
    %44 = tpu.matmul %39, %43, %cst_30 {dimension_numbers = #tpu.dot_dimension_numbers<[1], [0], [0], [1], [0, 0, 1, 1], [], []>} : vector<8x32xbf16>, vector<32x128xbf16>, vector<8x128xf32> -> vector<8x128xf32>
    %45 = vector.broadcast %42 : vector<8x1xf32> to vector<8x128xf32>
    %46 = arith.addf %44, %45 : vector<8x128xf32>
    %47 = vector.extract_strided_slice %46 {offsets = [0, 0], sizes = [1, 128], strides = [1, 1]} : vector<8x128xf32> to vector<1x128xf32>
    %c0_31 = arith.constant 0 : index
    %c0_32 = arith.constant 0 : index
    %48 = vector.load %arg4[%c0_31, %c0_32] : memref<1x128xf32, #tpu.memory_space<vmem>>, vector<1x128xf32>
    tpu.vector_store %arg4[%c0_31, %c0_32], %47 {strides = array<i32>} : memref<1x128xf32, #tpu.memory_space<vmem>>, vector<1x128xf32>,
    return
  }
  func.func @transform_0(%arg0: i32) -> (i32, i32) {
    %c0_i32 = arith.constant 0 : i32
    %c0_i32_0 = arith.constant 0 : i32
    return %c0_i32, %arg0 : i32, i32
  }
  func.func @transform_1(%arg0: i32) -> (i32, i32, i32) {
    %c0_i32 = arith.constant 0 : i32
    %c0_i32_0 = arith.constant 0 : i32
    %c0_i32_1 = arith.constant 0 : i32
    %c0_i32_2 = arith.constant 0 : i32
    return %c0_i32, %c0_i32_0, %c0_i32_1 : i32, i32, i32
  }
  func.func @transform_2(%arg0: i32) -> (i32, i32, i32) {
    %c0_i32 = arith.constant 0 : i32
    %c0_i32_0 = arith.constant 0 : i32
    %c0_i32_1 = arith.constant 0 : i32
    %c0_i32_2 = arith.constant 0 : i32
    return %c0_i32, %c0_i32_0, %c0_i32_1 : i32, i32, i32
  }
  func.func @transform_3(%arg0: i32) -> (i32, i32) {
    %c0_i32 = arith.constant 0 : i32
    %c0_i32_0 = arith.constant 0 : i32
    return %c0_i32, %arg0 : i32, i32
  }
}

</mosaic_0001>

<bundles_post_ra>
// kernel: mlp_forward.1
= control target key start
LH: loop header
LB: loop body
LE: loop exit
PB: predicated region body
PF: predicated region fallthrough
CT: control target
= control target key end

     0   :  { %vm61_vm0 = vcmask 1041408   ;;  %vm54_vm1 = vcmask 31744   ;;  %v626_v1 = vmov 0   ;;  %vm160_vm2 = vcmask 261120   ;;  %s742_s0 = inlined_call_operand.vmem [shape: bf16[4,128], index: 0, kind: input, shape index: {}]   ;;  %s743_s1 = inlined_call_operand.vmem [shape: bf16[5,32,32], index: 1, kind: input, shape index: {}]   ;;  %s744_s2 = inlined_call_operand.vmem [shape: f32[5,32,1], index: 2, kind: input, shape index: {}]   ;;  %s745_s3 = inlined_call_operand.vmem [shape: f32[1,128], index: 3, kind: output, shape index: {}]  }
   0x1   :  { %v15_v0 = vld [vmem:[%s742_s0] sm:$0x3]  ;;  %584 = vset.pattern.permute.xlu0 %v626_v1  ;;  %585 = vset.pattern.permute.xlu1 %v626_v1  ;;  %v587_v4 = vld [vmem:[%s743_s1 + $0x8] sm:$0xff]   ;;  %v22_v6 = vld [vmem:[%s744_s2 + $0x10] sm:$0xff]  ;;  %vm628_vm3 = vmmov 0  }
   0x2   :  { %580 = vmatprep.subr.msk.bf16.mxu0 %vm61_vm0, %v15_v0  ;;  %v63_v2 = vsel %vm61_vm0, %v15_v0, 0  ;;  %v586_v3 = vld [vmem:[%s743_s1] sm:$0xff]   ;;  %v21_v7 = vld [vmem:[%s744_s2 + $0x8] sm:$0xff]  ;;  %36 = vperm.xlu1 %585, %v22_v6   ;;  %v23_v8 = vld [vmem:[%s744_s2 + $0x18] sm:$0xff] }
   0x3   :  { %543 = vmatpush3.bf16.msra.mxu0 %v63_v2  ;;  %v20_v5 = vld [vmem:[%s744_s2] sm:$0xff]  ;;  %544 = vmatprep.mubr.msk.bf16.mxu0 %vm54_vm1, %v586_v3  ;;  %v490_v10 = vld [vmem:[%s744_s2 + $0x28] sm:$0xff]  ;;  %v491_v11 = vld [vmem:[%s744_s2 + $0x30] sm:$0xff] }
   0x4   :  { %26 = vperm.xlu0 %584, %v20_v5   ;;  %v489_v9 = vld [vmem:[%s744_s2 + $0x20] sm:$0xff]  ;;  %v492_v12 = vld [vmem:[%s744_s2 + $0x38] sm:$0xff]  ;;  %v502_v14 = vld [vmem:[%s744_s2 + $0x48] sm:$0xff] }
   0x5   :  { %v501_v13 = vld [vmem:[%s744_s2 + $0x40] sm:$0xff]  ;;  %v503_v15 = vld [vmem:[%s744_s2 + $0x50] sm:$0xff]  ;;  %v504_v16 = vld [vmem:[%s744_s2 + $0x58] sm:$0xff] }
   0x6   :  { %545 = vmatmul.mubr.msk.bf16.vlgmr.msra.gmra.mrb[0].mxu0 %vm54_vm1, %v587_v4  ;;  %41 = vperm.xlu1 %585, %v23_v8   ;;  %v513_v17 = vld [vmem:[%s744_s2 + $0x60] sm:$0xff]  ;;  %v514_v18 = vld [vmem:[%s744_s2 + $0x68] sm:$0xff]  ;;  %v515_v19 = vld [vmem:[%s744_s2 + $0x70] sm:$0xff] }
   0x7   :  { %v516_v20 = vld [vmem:[%s744_s2 + $0x78] sm:$0xff]  ;;  %v522_v21 = vld [vmem:[%s744_s2 + $0x80] sm:$0xff]  ;;  %v588_v22 = vld [vmem:[%s743_s1 + $0x10] sm:$0xff]  }
   0x8   :  { %31 = vperm.xlu0 %584, %v21_v7   ;;  %552 = vmatprep.mubr.msk.bf16.mxu1 %vm160_vm2, %v588_v22  ;;  %v589_v41 = vld [vmem:[%s743_s1 + $0x18] sm:$0xff]   ;;  %v590_v42 = vld [vmem:[%s743_s1 + $0x20] sm:$0xff]   ;;  %v591_v61 = vld [vmem:[%s743_s1 + $0x28] sm:$0xff]  }
   0x9   :  { %560 = vmatprep.mubr.msk.bf16.mxu0 %vm160_vm2, %v590_v42  ;;  %v592_v62 = vld [vmem:[%s743_s1 + $0x30] sm:$0xff]  }
   0xa   :  { %137 = vperm.xlu1 %585, %v490_v10  }
   0xc   :  { %132 = vperm.xlu0 %584, %v489_v9  }
   0xe   :  { %147 = vperm.xlu1 %585, %v492_v12  }
  0x10   :  { %142 = vperm.xlu0 %584, %v491_v11  }
  0x12   :  { %239 = vperm.xlu1 %585, %v502_v14  }
  0x14   :  { %234 = vperm.xlu0 %584, %v501_v13  }
  0x16   :  { %249 = vperm.xlu1 %585, %v504_v16  }
  0x18   :  { %244 = vperm.xlu0 %584, %v503_v15  }
  0x1a   :  { %340 = vperm.xlu1 %585, %v514_v18   ;;  %v627_v18 = vmov 0.0  }
  0x1c   :  { %335 = vperm.xlu0 %584, %v513_v17   ;;  %v593_v17 = vld [vmem:[%s743_s1 + $0x38] sm:$0xff]  }
  0x1e   :  { %350 = vperm.xlu1 %585, %v516_v20  }
  0x20   :  { %345 = vperm.xlu0 %584, %v515_v19  }
  0x24   :  { %430 = vperm.xlu0 %584, %v522_v21  }
  0x81   :  { %v37_v23 = vpop.permute.xlu1 %36 }
  0x83   :  { %v27_v24 = vpop.permute.xlu0 %26 }
  0x85   :  { %v42_v28 = vpop.permute.xlu1 %41 }
  0x87   :  { %v32_v31 = vpop.permute.xlu0 %31 }
  0x89   :  { %v138_v44 = vpop.permute.xlu1 %137 }
  0x8b   :  { %v133_v43 = vpop.permute.xlu0 %132 }
  0x8d   :  { %v148_v49 = vpop.permute.xlu1 %147 }
  0x8f   :  { %v143_v45 = vpop.permute.xlu0 %142 }
  0x91   :  { %v240_v0 = vpop.permute.xlu1 %239 }
  0x93   :  { %v235_v63 = vpop.permute.xlu0 %234 }
  0x95   :  { %v250_v5 = vpop.permute.xlu1 %249 }
  0x97   :  { %v245_v1 = vpop.permute.xlu0 %244 }
  0x99   :  { %v341_v20 = vpop.permute.xlu1 %340 }
  0x9b   :  { %v336_v19 = vpop.permute.xlu0 %335 }
  0x9f   :  { %v346_v21 = vpop.permute.xlu0 %345 }
  0xd9   :  { %v546_v25 = vpop.f32.mrb[0].mxu0 }
  0xda   :  { %v108_v26 = vadd.f32 %v546_v25, %v37_v23  ;;  %v99_v27 = vpop.f32.mrb[1].mxu0  ;;  %v351_v25 = vpop.permute.xlu1 %350 }
  0xdb   :  { %v100_v29 = vadd.f32 %v99_v27, %v27_v24  ;;  %v547_v30 = vpop.f32.mrb[2].mxu0 }
  0xdc   :  { %594 = vtanh.f32 %v108_v26  ;;  %v111_v32 = vadd.f32 %v547_v30, %v42_v28  ;;  %v102_v33 = vpop.f32.mrb[3].mxu0 }
  0xdd   :  { %596 = vtanh.f32 %v100_v29  ;;  %v103_v34 = vadd.f32 %v102_v33, %v32_v31 }
  0xde   :  { %598 = vtanh.f32 %v111_v32 }
  0xdf   :  { %600 = vtanh.f32 %v103_v34 }
  0xe6   :  { %v595_v35 = vpop.eup %594 }
  0xe7   :  { %v597_v36 = vpop.eup %596 }
  0xe8   :  { %v599_v37 = vpop.eup %598 }
  0xe9   :  { %v601_v38 = vpop.eup %600  ;;  %v124_v39 = vpack.c.bf16 %v599_v37, %v595_v35  ;;  %v521_v37 = vld [vmem:[%s743_s1 + $0x40] sm:$0xf] }
  0xea   :  { %v123_v40 = vpack.c.bf16 %v601_v38, %v597_v36  ;;  %v431_v38 = vpop.permute.xlu0 %430 }
  0xec   :  { %548 = vmatprep.subr.bf16.mxu1 %v123_v40 }
  0xed   :  { %549 = vmatpush3.bf16.msra.mxu1 %v123_v40 }
  0xee   :  { %550 = vmatprep.subr.bf16.mxu1 %v124_v39 }
  0xf1   :  { %551 = vmatpush3.bf16.msra.mxu1 %v124_v39 }
  0xf4   :  { %553 = vmatmul.mubr.msk.bf16.vlgmr.msra.gmra.mrb[0].mxu1 %vm160_vm2, %v589_v41 }
  0xf5   :  { %568 = vmatprep.mubr.msk.bf16.mxu1 %vm160_vm2, %v592_v62 }
 0x1c7   :  { %v554_v46 = vpop.f32.mrb[0].mxu1 }
 0x1c8   :  { %v210_v47 = vadd.f32 %v554_v46, %v143_v45  ;;  %v201_v48 = vpop.f32.mrb[1].mxu1 }
 0x1c9   :  { %v202_v50 = vadd.f32 %v201_v48, %v133_v43  ;;  %v555_v51 = vpop.f32.mrb[2].mxu1 }
 0x1ca   :  { %602 = vtanh.f32 %v210_v47  ;;  %v213_v52 = vadd.f32 %v555_v51, %v148_v49  ;;  %v204_v53 = vpop.f32.mrb[3].mxu1 }
 0x1cb   :  { %604 = vtanh.f32 %v202_v50  ;;  %v205_v54 = vadd.f32 %v204_v53, %v138_v44 }
 0x1cc   :  { %606 = vtanh.f32 %v213_v52 }
 0x1cd   :  { %608 = vtanh.f32 %v205_v54 }
 0x1d4   :  { %v603_v55 = vpop.eup %602 }
 0x1d5   :  { %v605_v56 = vpop.eup %604 }
 0x1d6   :  { %v607_v57 = vpop.eup %606 }
 0x1d7   :  { %v609_v58 = vpop.eup %608  ;;  %v226_v59 = vpack.c.bf16 %v607_v57, %v603_v55 }
 0x1d8   :  { %v225_v60 = vpack.c.bf16 %v609_v58, %v605_v56 }
 0x1da   :  { %556 = vmatprep.subr.bf16.mxu0 %v225_v60 }
 0x1db   :  { %557 = vmatpush3.bf16.msra.mxu0 %v225_v60 }
 0x1dc   :  { %558 = vmatprep.subr.bf16.mxu0 %v226_v59 }
 0x1df   :  { %559 = vmatpush3.bf16.msra.mxu0 %v226_v59 }
 0x1e0   :  { %572 = vmatprep.subr.bf16.mxu0 %v627_v18 }
 0x1e2   :  { %561 = vmatmul.mubr.msk.bf16.vlgmr.msra.gmra.mrb[4].mxu0 %vm160_vm2, %v591_v61 }
 0x1e3   :  { %576 = vmatprep.mubr.msk.bf16.mxu0 %vm628_vm3, %v627_v18 }
 0x2b5   :  { %v562_v2 = vpop.f32.mrb[4].mxu0 }
 0x2b6   :  { %v311_v3 = vadd.f32 %v562_v2, %v245_v1  ;;  %v302_v4 = vpop.f32.mrb[5].mxu0 }
 0x2b7   :  { %v303_v6 = vadd.f32 %v302_v4, %v235_v63  ;;  %v563_v7 = vpop.f32.mrb[6].mxu0 }
 0x2b8   :  { %610 = vtanh.f32 %v311_v3  ;;  %v314_v8 = vadd.f32 %v563_v7, %v250_v5  ;;  %v305_v9 = vpop.f32.mrb[7].mxu0 }
 0x2b9   :  { %612 = vtanh.f32 %v303_v6  ;;  %v306_v10 = vadd.f32 %v305_v9, %v240_v0 }
 0x2ba   :  { %614 = vtanh.f32 %v314_v8 }
 0x2bb   :  { %616 = vtanh.f32 %v306_v10 }
 0x2c2   :  { %v611_v11 = vpop.eup %610 }
 0x2c3   :  { %v613_v12 = vpop.eup %612 }
 0x2c4   :  { %v615_v13 = vpop.eup %614 }
 0x2c5   :  { %v617_v14 = vpop.eup %616  ;;  %v327_v15 = vpack.c.bf16 %v615_v13, %v611_v11 }
 0x2c6   :  { %v326_v16 = vpack.c.bf16 %v617_v14, %v613_v12 }
 0x2c8   :  { %564 = vmatprep.subr.bf16.mxu1 %v326_v16 }
 0x2c9   :  { %565 = vmatpush3.bf16.msra.mxu1 %v326_v16 }
 0x2ca   :  { %566 = vmatprep.subr.bf16.mxu1 %v327_v15 }
 0x2cd   :  { %567 = vmatpush3.bf16.msra.mxu1 %v327_v15 }
 0x2d0   :  { %569 = vmatmul.mubr.msk.bf16.vlgmr.msra.gmra.mrb[4].mxu1 %vm160_vm2, %v593_v17 }
 0x3a3   :  { %v570_v22 = vpop.f32.mrb[4].mxu1 }
 0x3a4   :  { %v412_v23 = vadd.f32 %v570_v22, %v346_v21  ;;  %v403_v24 = vpop.f32.mrb[5].mxu1 }
 0x3a5   :  { %v404_v26 = vadd.f32 %v403_v24, %v336_v19  ;;  %v571_v27 = vpop.f32.mrb[6].mxu1 }
 0x3a6   :  { %618 = vtanh.f32 %v412_v23  ;;  %v415_v28 = vadd.f32 %v571_v27, %v351_v25  ;;  %v406_v29 = vpop.f32.mrb[7].mxu1 }
 0x3a7   :  { %620 = vtanh.f32 %v404_v26  ;;  %v407_v30 = vadd.f32 %v406_v29, %v341_v20 }
 0x3a8   :  { %622 = vtanh.f32 %v415_v28 }
 0x3a9   :  { %624 = vtanh.f32 %v407_v30 }
 0x3b0   :  { %v619_v31 = vpop.eup %618 }
 0x3b1   :  { %v621_v32 = vpop.eup %620 }
 0x3b2   :  { %v623_v33 = vpop.eup %622 }
 0x3b3   :  { %v625_v34 = vpop.eup %624  ;;  %v427_v35 = vpack.c.bf16 %v623_v33, %v619_v31 }
 0x3b4   :  { %v426_v36 = vpack.c.bf16 %v625_v34, %v621_v32 }
 0x3b6   :  { %573 = vmatpush3.bf16.msra.mxu0 %v426_v36 }
 0x3b7   :  { %574 = vmatprep.subr.bf16.mxu0 %v627_v18 }
 0x3ba   :  { %575 = vmatpush3.bf16.msra.mxu0 %v427_v35 }
 0x3bd   :  { %577 = vmatmul.mubr.msk.bf16.vlgmr.msra.gmra.mrb[8].mxu0 %vm160_vm2, %v521_v37 }
 0x490   :  { %v470_v39 = vpop.f32.mrb[8].mxu0 }
 0x491   :  { %v471_v40 = vadd.f32 %v470_v39, %v431_v38  ;;  %v578_v41 = vpop.f32.mrb[9].mxu0 }
 0x492   :  { %v473_v42 = vpop.f32.mrb[10].mxu0 }
 0x493   :  { %476 = vst [vmem:[%s745_s3] sm:$0x1] %v471_v40  ;;  %v579_v43 = vpop.f32.mrb[11].mxu0 }

</bundles_post_ra>
